<compile_context>
chip_gen: v6e
topology: v6e:2x2x1
jax: 0.10.0
libtpu: 0.0.40
codegen_flags: <defaults>
</compile_context>

<pallas_src>
import jax
import jax.numpy as jnp
from jax.experimental import pallas as pl
from jax.experimental.pallas import tpu as pltpu


def _preprocess_kernel(x_ref, mean_ref, inv_std_ref, o_ref):
    # x_ref:       (TR, cols)   TR rows of the flattened (N*C, H*W) image
    # mean_ref:    (TR, 1)      per-row mean, broadcast across lanes
    # inv_std_ref: (TR, 1)      per-row 1/std, broadcast across lanes
    o_ref[...] = (x_ref[...] - mean_ref[...]) * inv_std_ref[...]


def _pick_row_tile(rows, cols, dtype_bytes, target_block_bytes=2 << 20):
    """Row-tile size: multiple of 8 (or full rows), ~target_block_bytes per block."""
    tr = target_block_bytes // max(1, cols * dtype_bytes)
    tr = (tr // 8) * 8
    tr = max(8, tr)
    if tr >= rows:
        # Full extent (also covers rows not divisible by 8).
        return rows
    return tr


def preprocess(x_nchw, mean_c, std_c):
    """(x - mean) / std with per-channel mean/std, NCHW input.

    x_nchw : (N, C, H, W) float32
    mean_c : (C,) float32
    std_c  : (C,) float32
    """
    N, C, H, W = x_nchw.shape
    rows, cols = N * C, H * W

    x2d = x_nchw.reshape(rows, cols)

    # Per-row (n, c) normalization columns; invert std once on the tiny vector.
    mean_rows = jnp.tile(mean_c.astype(x2d.dtype), (N,)).reshape(rows, 1)
    inv_std_rows = jnp.tile(
        (1.0 / std_c.astype(x2d.dtype)), (N,)
    ).reshape(rows, 1)

    tr = _pick_row_tile(rows, cols, jnp.dtype(x2d.dtype).itemsize)
    grid = (pl.cdiv(rows, tr),)

    out2d = pl.pallas_call(
        _preprocess_kernel,
        out_shape=jax.ShapeDtypeStruct((rows, cols), x2d.dtype),
        grid=grid,
        in_specs=[
            pl.BlockSpec((tr, cols), lambda i: (i, 0)),
            pl.BlockSpec((tr, 1), lambda i: (i, 0)),
            pl.BlockSpec((tr, 1), lambda i: (i, 0)),
        ],
        out_specs=pl.BlockSpec((tr, cols), lambda i: (i, 0)),
        compiler_params=pltpu.CompilerParams(
            dimension_semantics=("parallel",),
        ),
    )(x2d, mean_rows, inv_std_rows)

    return out2d.reshape(N, C, H, W)


if __name__ == "__main__":
    key = jax.random.PRNGKey(0)
    kx, km, ks = jax.random.split(key, 3)

    N, C, H, W = 2, 4, 16, 16
    x = jax.random.normal(kx, (N, C, H, W), dtype=jnp.float32)

    # Deterministic synthetic per-channel normalization parameters.
    mean = jax.random.normal(km, (C,), dtype=jnp.float32) * 0.1
    std = jax.random.uniform(ks, (C,), dtype=jnp.float32, minval=0.5, maxval=1.5)

    out = preprocess(x, mean, std)
    out = jax.block_until_ready(out)

    # Reference in plain JAX (mirrors PyTorch broadcasting of (1, C, 1, 1)).
    ref = (x - mean.reshape(1, C, 1, 1)) / std.reshape(1, C, 1, 1)
    assert out.shape == (N, C, H, W)
    # Slightly loosened tolerance: kernel uses a precomputed reciprocal multiply
    # instead of true division (~1 ulp difference).
    assert jnp.allclose(out, ref, atol=1e-5, rtol=1e-5)

    print("KERNEL_OK")
</pallas_src>

<mosaic_0001>
module attributes {stable_mosaic.version = 11 : i64} {
  func.func @_preprocess_kernel(%arg0: i32, %arg1: memref<8x256xf32, #tpu.memory_space<vmem>>, %arg2: memref<8x1xf32, #tpu.memory_space<vmem>>, %arg3: memref<8x1xf32, #tpu.memory_space<vmem>>, %arg4: memref<8x256xf32, #tpu.memory_space<vmem>>) attributes {dimension_semantics = [#tpu.dimension_semantics<parallel>], iteration_bounds = array<i64: 1>, scalar_prefetch = 0 : i64, scratch_operands = 0 : i64, tpu.core_type = #tpu.core_type<tc>, window_params = [{transform_indices = @transform_0, window_bounds = array<i64: 8, 256>}, {transform_indices = @transform_1, window_bounds = array<i64: 8, 1>}, {transform_indices = @transform_2, window_bounds = array<i64: 8, 1>}, {transform_indices = @transform_3, window_bounds = array<i64: 8, 256>}]} {
    %c0 = arith.constant 0 : index
    %c0_0 = arith.constant 0 : index
    %0 = vector.load %arg1[%c0, %c0_0] : memref<8x256xf32, #tpu.memory_space<vmem>>, vector<8x256xf32>
    %c0_1 = arith.constant 0 : index
    %c0_2 = arith.constant 0 : index
    %1 = vector.load %arg2[%c0_1, %c0_2] : memref<8x1xf32, #tpu.memory_space<vmem>>, vector<8x1xf32>
    %2 = vector.broadcast %1 : vector<8x1xf32> to vector<8x256xf32>
    %3 = arith.subf %0, %2 : vector<8x256xf32>
    %c0_3 = arith.constant 0 : index
    %c0_4 = arith.constant 0 : index
    %4 = vector.load %arg3[%c0_3, %c0_4] : memref<8x1xf32, #tpu.memory_space<vmem>>, vector<8x1xf32>
    %5 = vector.broadcast %4 : vector<8x1xf32> to vector<8x256xf32>
    %6 = arith.mulf %3, %5 : vector<8x256xf32>
    %c0_5 = arith.constant 0 : index
    %c0_6 = arith.constant 0 : index
    %7 = vector.load %arg4[%c0_5, %c0_6] : memref<8x256xf32, #tpu.memory_space<vmem>>, vector<8x256xf32>
    tpu.vector_store %arg4[%c0_5, %c0_6], %6 {strides = array<i32>} : memref<8x256xf32, #tpu.memory_space<vmem>>, vector<8x256xf32>,
    return
  }
  func.func @transform_0(%arg0: i32) -> (i32, i32) {
    %c0_i32 = arith.constant 0 : i32
    %c0_i32_0 = arith.constant 0 : i32
    return %arg0, %c0_i32 : i32, i32
  }
  func.func @transform_1(%arg0: i32) -> (i32, i32) {
    %c0_i32 = arith.constant 0 : i32
    %c0_i32_0 = arith.constant 0 : i32
    return %arg0, %c0_i32 : i32, i32
  }
  func.func @transform_2(%arg0: i32) -> (i32, i32) {
    %c0_i32 = arith.constant 0 : i32
    %c0_i32_0 = arith.constant 0 : i32
    return %arg0, %c0_i32 : i32, i32
  }
  func.func @transform_3(%arg0: i32) -> (i32, i32) {
    %c0_i32 = arith.constant 0 : i32
    %c0_i32_0 = arith.constant 0 : i32
    return %arg0, %c0_i32 : i32, i32
  }
}

</mosaic_0001>

<bundles_post_ra>
// kernel: tpu_custom_call.1
= control target key start
LH: loop header
LB: loop body
LE: loop exit
PB: predicated region body
PF: predicated region fallthrough
CT: control target
= control target key end

     0   :  { %v74_v1 = vmov 0   ;;  %s111_s0 = inlined_call_operand.vmem [shape: f32[8,256], index: 0, kind: input, shape index: {}]   ;;  %s112_s1 = inlined_call_operand.vmem [shape: f32[8,1], index: 1, kind: input, shape index: {}]   ;;  %s113_s2 = inlined_call_operand.vmem [shape: f32[8,1], index: 2, kind: input, shape index: {}]   ;;  %s114_s3 = inlined_call_operand.hbm [shape: f32[8,256], index: 3, kind: output, shape index: {}]  }
   0x1   :  { %v17_v0 = vld [vmem:[%s112_s1] sm:$0xff]  ;;  %51 = vset.pattern.permute.xlu0 %v74_v1 }
   0x2   :  { %8 = vsyncpa [#allocation3], 0  ;;  %20 = vperm.xlu0 %51, %v17_v0   ;;  %v25_v2 = vld [vmem:[%s113_s2] sm:$0xff]  ;;  %v16_v5 = vld [vmem:[%s111_s0 + $0x8] sm:$0xff]  ;;  %s75_s20 = smov [#allocation2]  }
   0x3   :  { %v15_v4 = vld [vmem:[%s111_s0] sm:$0xff]  ;;  %s41_s1 = sshll.u32 %s75_s20, 4  ;;  %s42_s1 = int_to_ptr.vmem [resolvable:$true] %s41_s1 }
   0x4   :  { %s52_s2 = scalar_lea.vmem %s42_s1, 256  ;;  %p57_p1 = scmp.lt.s32.totalorder %s42_s1, %s42_s1 }
   0x5   :  { %p53_p0 = scmp.ne.s32.totalorder %s42_s1, %s52_s2  ;;  %p58_p2 = scmp.lt.s32.totalorder %s52_s2, %s52_s2 }
   0x6   :  { %28 = vperm.xlu0 %51, %v25_v2  }
   0x7   :  { %p59_p3 = por %p58_p2, %p57_p1 }
   0x9   :  { %p60_p4 = pnand %p59_p3, %p53_p0 }
  0x7d   :  { %v21_v3 = vpop.permute.xlu0 %20 }
  0x7e   :  { %v23_v6 = vsub.f32 %v15_v4, %v21_v3  ;;  %v24_v7 = vsub.f32 %v16_v5, %v21_v3 }
  0x81   :  { %v29_v8 = vpop.permute.xlu0 %28 }
  0x82   :  { %v31_v9 = vmul.f32 %v29_v8, %v23_v6  ;;  %v32_v10 = vmul.f32 %v29_v8, %v24_v7 }
  0x84   :  { %33 = vst [vmem:[#allocation2] sm:$0xff] %v31_v9  ;;  %34 = vst [vmem:[#allocation2 + $0x8] sm:$0xff] %v32_v10 }
  0x85   :  { %63 = shalt.err (!%p60_p4)
}
  0x86   :  { %44 = dma.vmem_to_hbm [thread:$0]  %s42_s1, 256, %s114_s3, [#allocation3]  }
  0x87   :  { %72 = dma.done.wait [#allocation3], 256  }
  0x88   :  { %73 = vsyncadd [#allocation3], 4294967040 }
  0x89   :  { %48 = vsyncpa [#allocation3], 1 }

</bundles_post_ra>
